<compile_context>
chip_gen: v7x
topology: tpu7x:2x2x1
jax: 0.10.0
libtpu: 0.0.40
codegen_flags: <defaults>
</compile_context>

<pallas_src>
import math

import jax
import jax.numpy as jnp
from jax import lax
from jax.experimental import pallas as pl
from jax.experimental.pallas import tpu as pltpu


NEG_INF = -1e30  # large finite negative (safe even for fully-masked rows)

_VMEM_LIMIT = None


def _vmem_limit():
    """Generation-aware scoped-VMEM limit (~40 MiB on v7x, ~100 MiB on v5e/v6e)."""
    global _VMEM_LIMIT
    if _VMEM_LIMIT is None:
        try:
            cap = int(pltpu.get_tpu_info().vmem_capacity_bytes)
        except Exception:
            cap = 128 * 1024 * 1024
        _VMEM_LIMIT = int(max(32 * 2**20, min(cap - 24 * 2**20, 100 * 2**20)))
    return _VMEM_LIMIT


def _seq_tile(T):
    """Sequence tile: second grid axis for kernels that are row-wise in T."""
    if T % 256 == 0:
        return min(T, 256)
    if T % 128 == 0:
        return min(T, 128)
    return T


# ---------------------------------------------------------------------------
# In-kernel helpers
# ---------------------------------------------------------------------------
def _layernorm(h, w, b, eps=1e-5):
    # h: (T, C) f32; w, b: (1, C) f32
    mu = jnp.mean(h, axis=-1, keepdims=True)
    var = jnp.mean((h - mu) ** 2, axis=-1, keepdims=True)
    return (h - mu) * lax.rsqrt(var + eps) * w + b


# ---------------------------------------------------------------------------
# Kernels
# ---------------------------------------------------------------------------
def qkv_kernel(x_ref, ln1w_ref, ln1b_ref, wqkv_ref, bqkv_ref, qkv_ref):
    # ln1 -> fused QKV projection: (tt,C) @ (C,3C)
    h = _layernorm(x_ref[...], ln1w_ref[...], ln1b_ref[...])
    qkv = jnp.dot(h.astype(jnp.bfloat16), wqkv_ref[...],
                  preferred_element_type=jnp.float32) + bqkv_ref[...]
    qkv_ref[...] = qkv.astype(jnp.bfloat16)


def attn_kernel(q_ref, k_ref, v_ref, o_ref):
    # One (batch, head) pair per grid step; q is pre-scaled (folded into w_qkv).
    q = q_ref[...]                                            # (T, hd) bf16
    k = k_ref[...]                                            # (T, hd) bf16
    att = lax.dot_general(q, k, (((1,), (1,)), ((), ())),
                          preferred_element_type=jnp.float32)  # (T, T) f32
    T = att.shape[0]
    row = lax.broadcasted_iota(jnp.int32, (T, T), 0)
    col = lax.broadcasted_iota(jnp.int32, (T, T), 1)
    att = jnp.where(row >= col, att, NEG_INF)                  # causal mask
    att = att - jnp.max(att, axis=-1, keepdims=True)
    p = jnp.exp(att)
    p = p * pl.reciprocal(jnp.sum(p, axis=-1, keepdims=True), approx=True)
    y = jnp.dot(p.astype(jnp.bfloat16), v_ref[...],
                preferred_element_type=jnp.float32)            # (T, hd) f32
    o_ref[...] = y.astype(jnp.bfloat16)


def post_kernel(x_ref, y_ref, wproj_ref, bproj_ref, ln2w_ref, ln2b_ref,
                wfc_ref, bfc_ref, wfcp_ref, bfcp_ref, out_ref):
    # attn output projection + residual -> ln2 -> MLP -> residual
    x = x_ref[...]                                             # (tt, C) f32
    attn_out = jnp.dot(y_ref[...], wproj_ref[...],
                       preferred_element_type=jnp.float32) + bproj_ref[...]
    x1 = x + attn_out
    h2 = _layernorm(x1, ln2w_ref[...], ln2b_ref[...])
    f = jnp.dot(h2.astype(jnp.bfloat16), wfc_ref[...],
                preferred_element_type=jnp.float32) + bfc_ref[...]
    f = jax.nn.gelu(f, approximate=False)                      # exact GELU (nn.GELU())
    f = jnp.dot(f.astype(jnp.bfloat16), wfcp_ref[...],
                preferred_element_type=jnp.float32) + bfcp_ref[...]
    out_ref[...] = x1 + f


def lnf_kernel(x_ref, w_ref, b_ref, o_ref):
    # final LayerNorm, computed once per token (not per vocab tile)
    o_ref[...] = _layernorm(x_ref[...], w_ref[...], b_ref[...]).astype(jnp.bfloat16)


def head_kernel(xn_ref, wvt_ref, out_ref):
    # lm_head (tied, pre-transposed bf16 weight), tiled over vocab
    out_ref[...] = jnp.dot(xn_ref[...], wvt_ref[...],
                           preferred_element_type=jnp.float32)


# ---------------------------------------------------------------------------
# pallas_call wrappers
# ---------------------------------------------------------------------------
def _wspec(shape):
    # rank-2 constant-index weight spec for 2-axis grids
    return pl.BlockSpec(shape, lambda b, t: (0, 0))


def _cparams(n_axes):
    return pltpu.CompilerParams(
        dimension_semantics=("parallel",) * n_axes,
        vmem_limit_bytes=_vmem_limit())


def run_qkv(x, blk):
    B, T, C = x.shape
    tt = _seq_tile(T)
    nt = T // tt
    xspec = pl.BlockSpec((None, tt, C), lambda b, t: (b, t, 0))
    weights = (blk["ln1_w"], blk["ln1_b"], blk["w_qkv"], blk["b_qkv"])
    return pl.pallas_call(
        qkv_kernel,
        out_shape=jax.ShapeDtypeStruct((B, T, 3 * C), jnp.bfloat16),
        grid=(B, nt),
        in_specs=[xspec] + [_wspec(w.shape) for w in weights],
        out_specs=pl.BlockSpec((None, tt, 3 * C), lambda b, t: (b, t, 0)),
        compiler_params=_cparams(2),
    )(x, *weights)


def run_attn(q, k, v):
    B, H, T, hd = q.shape
    spec = pl.BlockSpec((None, None, T, hd), lambda b, h: (b, h, 0, 0))
    return pl.pallas_call(
        attn_kernel,
        out_shape=jax.ShapeDtypeStruct((B, H, T, hd), jnp.bfloat16),
        grid=(B, H),
        in_specs=[spec, spec, spec],
        out_specs=spec,
        compiler_params=_cparams(2),
    )(q, k, v)


def run_post(x, y, blk):
    B, T, C = x.shape
    tt = _seq_tile(T)
    nt = T // tt
    xspec = pl.BlockSpec((None, tt, C), lambda b, t: (b, t, 0))
    weights = (blk["w_proj"], blk["b_proj"], blk["ln2_w"], blk["ln2_b"],
               blk["w_fc"], blk["b_fc"], blk["w_fcp"], blk["b_fcp"])
    return pl.pallas_call(
        post_kernel,
        out_shape=jax.ShapeDtypeStruct((B, T, C), jnp.float32),
        grid=(B, nt),
        in_specs=[xspec, xspec] + [_wspec(w.shape) for w in weights],
        out_specs=xspec,
        compiler_params=_cparams(2),
    )(x, y, *weights)


def run_lnf(x, w, b):
    B, T, C = x.shape
    tt = _seq_tile(T)
    nt = T // tt
    xspec = pl.BlockSpec((None, tt, C), lambda b, t: (b, t, 0))
    return pl.pallas_call(
        lnf_kernel,
        out_shape=jax.ShapeDtypeStruct((B, T, C), jnp.bfloat16),
        grid=(B, nt),
        in_specs=[xspec, _wspec(w.shape), _wspec(b.shape)],
        out_specs=xspec,
        compiler_params=_cparams(2),
    )(x, w, b)


def run_head(xn, wte_t):
    B, T, C = xn.shape
    V = wte_t.shape[1]
    # bigger lane-dense vocab tiles where VMEM allows (v5e/v6e), smaller on v7x
    TV = min(V, 8192 if _vmem_limit() >= 90 * 2**20 else 2048)
    nv = pl.cdiv(V, TV)
    return pl.pallas_call(
        head_kernel,
        out_shape=jax.ShapeDtypeStruct((B, T, V), jnp.float32),
        grid=(B, nv),
        in_specs=[pl.BlockSpec((None, T, C), lambda b, v: (b, 0, 0)),
                  pl.BlockSpec((C, TV), lambda b, v: (0, v))],
        out_specs=pl.BlockSpec((None, T, TV), lambda b, v: (b, 0, v)),
        compiler_params=_cparams(2),
    )(xn, wte_t)


# ---------------------------------------------------------------------------
# Parameter init (mirrors GPT._init_weights shapes/stats; matmul weights bf16,
# QKV fused with the 1/sqrt(hd) scale folded into the Q columns, lm_head tied
# weight pre-transposed once).
# ---------------------------------------------------------------------------
def init_params(key, vocab_size, block_size, n_layer, n_head, n_embd):
    C = n_embd
    hd = C // n_head
    std = 0.02
    proj_std = 0.02 / math.sqrt(2 * n_layer)
    q_scale = 1.0 / math.sqrt(hd)
    keys = jax.random.split(key, 2 + 4 * n_layer)

    wte = std * jax.random.normal(keys[0], (vocab_size, C), jnp.float32)
    params = {
        "wte": wte,                                   # f32 for embedding gather
        "wte_t": wte.T.astype(jnp.bfloat16),          # tied lm_head, (C, V) bf16
        "wpe": std * jax.random.normal(keys[1], (block_size, C), jnp.float32),
        "ln_f_w": jnp.ones((1, C), jnp.float32),
        "ln_f_b": jnp.zeros((1, C), jnp.float32),
        "blocks": [],
    }
    for l in range(n_layer):
        k = keys[2 + 4 * l: 6 + 4 * l]
        w_qkv = std * jax.random.normal(k[0], (C, 3 * C), jnp.float32)
        # fold the pre-softmax 1/sqrt(hd) scale into the Q columns
        # (biases are zero-initialized; a nonzero q-bias would need the same scale)
        w_qkv = w_qkv.at[:, :C].multiply(q_scale)
        blk = {
            "ln1_w": jnp.ones((1, C), jnp.float32),
            "ln1_b": jnp.zeros((1, C), jnp.float32),
            "w_qkv": w_qkv.astype(jnp.bfloat16),                # (C, 3C)
            "b_qkv": jnp.zeros((1, 3 * C), jnp.float32),
            "w_proj": (proj_std * jax.random.normal(k[1], (C, C))).astype(jnp.bfloat16),
            "b_proj": jnp.zeros((1, C), jnp.float32),
            "ln2_w": jnp.ones((1, C), jnp.float32),
            "ln2_b": jnp.zeros((1, C), jnp.float32),
            "w_fc": (std * jax.random.normal(k[2], (C, 4 * C))).astype(jnp.bfloat16),
            "b_fc": jnp.zeros((1, 4 * C), jnp.float32),
            "w_fcp": (proj_std * jax.random.normal(k[3], (4 * C, C))).astype(jnp.bfloat16),
            "b_fcp": jnp.zeros((1, C), jnp.float32),
        }
        params["blocks"].append(blk)
    return params


# ---------------------------------------------------------------------------
# GPT forward (inference: targets=None, dropout inactive)
# ---------------------------------------------------------------------------
def gpt_forward(params, idx, n_head):
    B, T = idx.shape
    C = params["wpe"].shape[1]
    hd = C // n_head

    # Embedding gathers + head split/merge are plain-JAX HBM glue.
    x = params["wte"][idx] + params["wpe"][:T][None, :, :]     # (B, T, C) f32

    for blk in params["blocks"]:
        qkv = run_qkv(x, blk)                                   # (B, T, 3C) bf16
        qkv = qkv.reshape(B, T, 3, n_head, hd)
        q = jnp.transpose(qkv[:, :, 0], (0, 2, 1, 3))           # (B, H, T, hd)
        k = jnp.transpose(qkv[:, :, 1], (0, 2, 1, 3))
        v = jnp.transpose(qkv[:, :, 2], (0, 2, 1, 3))
        y = run_attn(q, k, v)                                   # (B, H, T, hd) bf16
        y = jnp.transpose(y, (0, 2, 1, 3)).reshape(B, T, C)     # (B, T, C) bf16
        x = run_post(x, y, blk)                                 # (B, T, C) f32

    xn = run_lnf(x, params["ln_f_w"], params["ln_f_b"])         # (B, T, C) bf16
    return run_head(xn, params["wte_t"])                        # (B, T, V) f32


if __name__ == "__main__":
    # small GPT config
    vocab_size, block_size = 64, 16
    n_layer, n_head, n_embd = 2, 4, 32
    B, T = 2, 8

    key = jax.random.PRNGKey(0)
    pkey, ikey = jax.random.split(key)
    params = init_params(pkey, vocab_size, block_size, n_layer, n_head, n_embd)
    idx = jax.random.randint(ikey, (B, T), 0, vocab_size, dtype=jnp.int32)

    logits = gpt_forward(params, idx, n_head)
    jax.block_until_ready(logits)
    assert logits.shape == (B, T, vocab_size)
    print("KERNEL_OK")
</pallas_src>

<mosaic_0001>
module attributes {stable_mosaic.version = 11 : i64} {
  func.func @qkv_kernel(%arg0: i32, %arg1: i32, %arg2: memref<1x8x32xf32, #tpu.memory_space<vmem>>, %arg3: memref<1x32xf32, #tpu.memory_space<vmem>>, %arg4: memref<1x32xf32, #tpu.memory_space<vmem>>, %arg5: memref<32x96xbf16, #tpu.memory_space<vmem>>, %arg6: memref<1x96xf32, #tpu.memory_space<vmem>>, %arg7: memref<1x8x96xbf16, #tpu.memory_space<vmem>>) attributes {dimension_semantics = [#tpu.dimension_semantics<parallel>, #tpu.dimension_semantics<parallel>], iteration_bounds = array<i64: 2, 1>, scalar_prefetch = 0 : i64, scratch_operands = 0 : i64, tpu.core_type = #tpu.core_type<tc>, window_params = [{transform_indices = @transform_0, window_bounds = array<i64: 1, 8, 32>}, {pipeline_mode = #tpu.pipeline_mode<synchronous>, transform_indices = @transform_1, window_bounds = array<i64: 1, 32>}, {pipeline_mode = #tpu.pipeline_mode<synchronous>, transform_indices = @transform_2, window_bounds = array<i64: 1, 32>}, {pipeline_mode = #tpu.pipeline_mode<synchronous>, transform_indices = @transform_3, window_bounds = array<i64: 32, 96>}, {pipeline_mode = #tpu.pipeline_mode<synchronous>, transform_indices = @transform_4, window_bounds = array<i64: 1, 96>}, {transform_indices = @transform_5, window_bounds = array<i64: 1, 8, 96>}]} {
    %c0 = arith.constant 0 : index
    %c0_0 = arith.constant 0 : index
    %c0_1 = arith.constant 0 : index
    %0 = vector.load %arg2[%c0, %c0_0, %c0_1] : memref<1x8x32xf32, #tpu.memory_space<vmem>>, vector<1x8x32xf32>
    %1 = vector.shape_cast %0 : vector<1x8x32xf32> to vector<8x32xf32>
    %c0_2 = arith.constant 0 : index
    %c0_3 = arith.constant 0 : index
    %2 = vector.load %arg3[%c0_2, %c0_3] : memref<1x32xf32, #tpu.memory_space<vmem>>, vector<1x32xf32>
    %c0_4 = arith.constant 0 : index
    %c0_5 = arith.constant 0 : index
    %3 = vector.load %arg4[%c0_4, %c0_5] : memref<1x32xf32, #tpu.memory_space<vmem>>, vector<1x32xf32>
    %cst = arith.constant dense<0.000000e+00> : vector<8xf32>
    %4 = vector.multi_reduction <add>, %1, %cst [1] : vector<8x32xf32> to vector<8xf32>
    %5 = vector.shape_cast %4 : vector<8xf32> to vector<8x1xf32>
    %cst_6 = arith.constant 3.200000e+01 : f32
    %6 = vector.broadcast %cst_6 : f32 to vector<8x1xf32>
    %7 = arith.divf %5, %6 : vector<8x1xf32>
    %8 = vector.broadcast %7 : vector<8x1xf32> to vector<8x32xf32>
    %9 = arith.subf %1, %8 : vector<8x32xf32>
    %10 = arith.mulf %9, %9 : vector<8x32xf32>
    %cst_7 = arith.constant dense<0.000000e+00> : vector<8xf32>
    %11 = vector.multi_reduction <add>, %10, %cst_7 [1] : vector<8x32xf32> to vector<8xf32>
    %12 = vector.shape_cast %11 : vector<8xf32> to vector<8x1xf32>
    %cst_8 = arith.constant 3.200000e+01 : f32
    %13 = vector.broadcast %cst_8 : f32 to vector<8x1xf32>
    %14 = arith.divf %12, %13 : vector<8x1xf32>
    %15 = vector.broadcast %7 : vector<8x1xf32> to vector<8x32xf32>
    %16 = arith.subf %1, %15 : vector<8x32xf32>
    %cst_9 = arith.constant 9.99999974E-6 : f32
    %17 = vector.broadcast %cst_9 : f32 to vector<8x1xf32>
    %18 = arith.addf %14, %17 : vector<8x1xf32>
    %19 = math.rsqrt %18 : vector<8x1xf32>
    %20 = vector.broadcast %19 : vector<8x1xf32> to vector<8x32xf32>
    %21 = arith.mulf %16, %20 : vector<8x32xf32>
    %22 = vector.broadcast %2 : vector<1x32xf32> to vector<8x32xf32>
    %23 = arith.mulf %21, %22 : vector<8x32xf32>
    %24 = vector.broadcast %3 : vector<1x32xf32> to vector<8x32xf32>
    %25 = arith.addf %23, %24 : vector<8x32xf32>
    %26 = arith.truncf %25 : vector<8x32xf32> to vector<8x32xbf16>
    %c0_10 = arith.constant 0 : index
    %c0_11 = arith.constant 0 : index
    %27 = vector.load %arg5[%c0_10, %c0_11] : memref<32x96xbf16, #tpu.memory_space<vmem>>, vector<32x96xbf16>
    %cst_12 = arith.constant dense<0.000000e+00> : vector<8x96xf32>
    %28 = tpu.matmul %26, %27, %cst_12 {dimension_numbers = #tpu.dot_dimension_numbers<[1], [0], [0], [1], [0, 0, 1, 1], [], []>} : vector<8x32xbf16>, vector<32x96xbf16>, vector<8x96xf32> -> vector<8x96xf32>
    %c0_13 = arith.constant 0 : index
    %c0_14 = arith.constant 0 : index
    %29 = vector.load %arg6[%c0_13, %c0_14] : memref<1x96xf32, #tpu.memory_space<vmem>>, vector<1x96xf32>
    %30 = vector.broadcast %29 : vector<1x96xf32> to vector<8x96xf32>
    %31 = arith.addf %28, %30 : vector<8x96xf32>
    %32 = arith.truncf %31 : vector<8x96xf32> to vector<8x96xbf16>
    %c0_15 = arith.constant 0 : index
    %c0_16 = arith.constant 0 : index
    %c0_17 = arith.constant 0 : index
    %33 = vector.load %arg7[%c0_15, %c0_16, %c0_17] : memref<1x8x96xbf16, #tpu.memory_space<vmem>>, vector<1x8x96xbf16>
    %34 = vector.shape_cast %33 : vector<1x8x96xbf16> to vector<8x96xbf16>
    %35 = vector.shape_cast %32 : vector<8x96xbf16> to vector<1x8x96xbf16>
    tpu.vector_store %arg7[%c0_15, %c0_16, %c0_17], %35 {strides = array<i32>} : memref<1x8x96xbf16, #tpu.memory_space<vmem>>, vector<1x8x96xbf16>,
    return
  }
  func.func @transform_0(%arg0: i32, %arg1: i32) -> (i32, i32, i32) {
    %c0_i32 = arith.constant 0 : i32
    %c0_i32_0 = arith.constant 0 : i32
    return %arg0, %arg1, %c0_i32 : i32, i32, i32
  }
  func.func @transform_1(%arg0: i32, %arg1: i32) -> (i32, i32) {
    %c0_i32 = arith.constant 0 : i32
    %c0_i32_0 = arith.constant 0 : i32
    %c0_i32_1 = arith.constant 0 : i32
    return %c0_i32, %c0_i32_0 : i32, i32
  }
  func.func @transform_2(%arg0: i32, %arg1: i32) -> (i32, i32) {
    %c0_i32 = arith.constant 0 : i32
    %c0_i32_0 = arith.constant 0 : i32
    %c0_i32_1 = arith.constant 0 : i32
    return %c0_i32, %c0_i32_0 : i32, i32
  }
  func.func @transform_3(%arg0: i32, %arg1: i32) -> (i32, i32) {
    %c0_i32 = arith.constant 0 : i32
    %c0_i32_0 = arith.constant 0 : i32
    %c0_i32_1 = arith.constant 0 : i32
    return %c0_i32, %c0_i32_0 : i32, i32
  }
  func.func @transform_4(%arg0: i32, %arg1: i32) -> (i32, i32) {
    %c0_i32 = arith.constant 0 : i32
    %c0_i32_0 = arith.constant 0 : i32
    %c0_i32_1 = arith.constant 0 : i32
    return %c0_i32, %c0_i32_0 : i32, i32
  }
  func.func @transform_5(%arg0: i32, %arg1: i32) -> (i32, i32, i32) {
    %c0_i32 = arith.constant 0 : i32
    %c0_i32_0 = arith.constant 0 : i32
    return %arg0, %arg1, %c0_i32 : i32, i32, i32
  }
}

</mosaic_0001>

<bundles_post_ra>
// kernel: tpu_custom_call.1
= control target key start
LH: loop header
LB: loop body
LE: loop exit
PB: predicated region body
PF: predicated region fallthrough
CT: control target
= control target key end

     0   :  { %10 = vsyncpa [#allocation3], 0  ;;  %s1260_s0 = inlined_call_operand.hbm [shape: f32[2,8,32], index: 0, kind: input, shape index: {}]   ;;  %s1261_s1 = inlined_call_operand.hbm [shape: f32[1,32], index: 1, kind: input, shape index: {}]   ;;  %s1262_s2 = inlined_call_operand.hbm [shape: f32[1,32], index: 2, kind: input, shape index: {}]   ;;  %s1263_s3 = inlined_call_operand.hbm [shape: bf16[32,96], index: 3, kind: input, shape index: {}]   ;;  %s1264_s4 = inlined_call_operand.hbm [shape: f32[1,96], index: 4, kind: input, shape index: {}]   ;;  %s1265_s5 = inlined_call_operand.hbm [shape: bf16[2,8,96], index: 5, kind: output, shape index: {}]  }
   0x1   :  { %12 = vsyncpa [#allocation3 + $0x1], 0 }
   0x2   :  { %13 = vsyncpa [#allocation6], 0 }
   0x3   :  { %14 = vsyncpa [#allocation9], 0 }
   0x4   :  { %15 = vsyncpa [#allocation4], 0 }
   0x5   :  { %17 = vsyncpa [#allocation4 + $0x1], 0  ;;  %s968_s18 = smov 0   ;;  %s970_s19 = smov 0  }
   0x6   :  { %s972_s20 = smov 0   ;;  %s974_s21 = smov 0  }
   0x7   :  { %s976_s22 = smov 0   ;;  %s978_s23 = smov 0  }
   0x8 LB: > { %s545_s24 = sadd.s32 4294967295, %s926_s23   ;;  %p547_p0 = scmp.ge.s32.totalorder %s926_s23, 1  ;;  %s926_s23 = sphi %s978_s23, %s23_s23   ;;  %s922_s22 = sphi %s976_s22, %s1289_s22   ;;  %s918_s21 = sphi %s974_s21, %s1288_s21   ;;  %s914_s20 = sphi %s972_s20, %s1287_s20   ;;  %s910_s19 = sphi %s970_s19, %s1286_s19   ;;  %s906_s18 = sphi %s968_s18, %s1285_s18  }
   0x9   : > { %p1002_p1 = scmp.eq.s32.totalorder %s545_s24, 0  ;;  %p180_p2 = scmp.lt.s32.totalorder %s926_s23, 3 }
   0xa   : > { %s928_s27 = smov [#allocation5]   ;;  %s929_s29 = smov [#allocation8]  }
   0xb   : > { %s1270_s25 = scalar_select %p1002_p1, 1, 0 }
   0xc   : > { %p1007_p3 = pnand %p547_p0, %p180_p2  ;;  %s193_s28 = sshll.u32 %s928_s27, 4  ;;  %s194_s28 = int_to_ptr.vmem [resolvable:$true] %s193_s28 }
   0xd   : > { %s214_s30 = sshll.u32 %s929_s29, 4  ;;  %s930_s7 = smov [#allocation7]   ;;  %s1020_s30 = int_to_ptr.vmem [resolvable:$true] %s214_s30 }
   0xe   : > { %s1271_s26 = scalar_select %p1007_p3, 1, 0 }
   0xf   : > { %p603_p5 = pneg %p1007_p3  ;;  %s1022_s8 = sshll.u32 %s930_s7, 4  ;;  %s205_s8 = int_to_ptr.vmem [resolvable:$true] %s1022_s8 }
  0x10   : > { %s694_s11 = scalar_lea.hbm %s1261_s1, 16 }
  0x11   : > { %p1016_p6 = pnand %p603_p5, %p1002_p1  ;;  %p695_p7 = scmp.ne.s32.totalorder %s1261_s1, %s694_s11 }
  0x12   : > { %p701_p11 = scmp.lt.u32.totalorder %s694_s11, %s1261_s1 }
  0x13   : > { %p1032_p8 = pneg %p1016_p6 }
  0x15   : > { %p697_p9 = pnand %p1032_p8, %p695_p7 }
  0x17   : > { %p698_p10 = pneg %p697_p9 }
  0x19   : > { %p703_p12 = pnand %p701_p11, %p698_p10 }
  0x1b   : > { %706 = shalt.err (!%p703_p12)
}
  0x1c   : > { %s707_s17 = scalar_lea.vmem %s194_s28, 16  ;;  %s714_s27 = scalar_lea.vmem %s194_s28, 32 }
  0x1d   : > { %p708_p13 = scmp.ne.s32.totalorder %s194_s28, %s707_s17  ;;  %p715_p5 = scmp.lt.s32.totalorder %s194_s28, %s194_s28 }
  0x1e   : > { %p716_p4 = scmp.lt.s32.totalorder %s714_s27, %s707_s17 }
  0x1f   : > { %p710_p0 = pnand %p708_p13, %p1032_p8 }
  0x20   : > { %p717_p3 = por %p716_p4, %p715_p5 }
  0x21   : > { %p711_p2 = pneg %p710_p0 }
  0x23   : > { %p718_p1 = pnand %p717_p3, %p711_p2 }
  0x25   : > { %721 = shalt.err (!%p718_p1)
}
  0x26   : > { %606 = dma.hbm_to_vmem [thread:$0]  (!%p1016_p6), %s1261_s1, 16, %s194_s28, [#allocation6]  }
  0x27   : > { %s722_s11 = scalar_lea.hbm %s1263_s3, 256 }
  0x28   : > { %p723_p7 = scmp.ne.s32.totalorder %s1263_s3, %s722_s11  ;;  %p729_p1 = scmp.lt.u32.totalorder %s722_s11, %s1263_s3 }
  0x2a   : > { %p725_p9 = pnand %p723_p7, %p1032_p8 }
  0x2c   : > { %p726_p4 = pneg %p725_p9 }
  0x2e   : > { %p731_p3 = pnand %p729_p1, %p726_p4 }
  0x30   : > { %734 = shalt.err (!%p731_p3)
}
  0x31   : > { %s735_s28 = scalar_lea.vmem %s1020_s30, 256  ;;  %p743_p13 = scmp.lt.s32.totalorder %s1020_s30, %s1020_s30 }
  0x32   : > { %p736_p10 = scmp.ne.s32.totalorder %s1020_s30, %s735_s28  ;;  %p744_p0 = scmp.lt.s32.totalorder %s735_s28, %s735_s28 }
  0x34   : > { %p738_p11 = pnand %p736_p10, %p1032_p8  ;;  %p745_p2 = por %p744_p0, %p743_p13 }
  0x36   : > { %p739_p12 = pneg %p738_p11 }
  0x38   : > { %p746_p5 = pnand %p745_p2, %p739_p12 }
  0x3a   : > { %749 = shalt.err (!%p746_p5)
}
  0x3b   : > { %s931_s17 = smov 64   ;;  %s932_s27 = smov 4  }
  0x3c   : > { %612 = dma.hbm_to_vmem [thread:$0]  (!%p1016_p6), %s1263_s3, 256, %s1020_s30, [#allocation9], %s931_s17, %s931_s17, %s932_s27  }
  0x3d   : > { %s750_s11 = scalar_lea.hbm %s1262_s2, 16 }
  0x3e   : > { %p751_p7 = scmp.ne.s32.totalorder %s1262_s2, %s750_s11  ;;  %p757_p1 = scmp.lt.u32.totalorder %s750_s11, %s1262_s2 }
  0x40   : > { %p753_p9 = pnand %p751_p7, %p1032_p8 }
  0x42   : > { %p754_p4 = pneg %p753_p9 }
  0x44   : > { %p759_p3 = pnand %p757_p1, %p754_p4 }
  0x46   : > { %762 = shalt.err (!%p759_p3)
}
  0x47   : > { %s763_s28 = scalar_lea.vmem %s205_s8, 16  ;;  %s770_s30 = scalar_lea.vmem %s205_s8, 32 }
  0x48   : > { %p764_p10 = scmp.ne.s32.totalorder %s205_s8, %s763_s28  ;;  %p771_p13 = scmp.lt.s32.totalorder %s205_s8, %s205_s8 }
  0x49   : > { %p772_p0 = scmp.lt.s32.totalorder %s770_s30, %s763_s28 }
  0x4a   : > { %p766_p11 = pnand %p764_p10, %p1032_p8 }
  0x4b   : > { %p773_p2 = por %p772_p0, %p771_p13 }
  0x4c   : > { %p767_p12 = pneg %p766_p11 }
  0x4e   : > { %p774_p5 = pnand %p773_p2, %p767_p12 }
  0x50   : > { %777 = shalt.err (!%p774_p5)
}
  0x51   : > { %609 = dma.hbm_to_vmem [thread:$0]  (!%p1016_p6), %s1262_s2, 16, %s205_s8, [#allocation6]  }
  0x52   : > { %s933_s29 = smov [#allocation10]   ;;  %s778_s11 = scalar_lea.hbm %s1264_s4, 16 }
  0x53   : > { %s228_s7 = sshll.u32 %s933_s29, 4  ;;  %p779_p7 = scmp.ne.s32.totalorder %s1264_s4, %s778_s11  ;;  %s229_s7 = int_to_ptr.vmem [resolvable:$true] %s228_s7 }
  0x54   : > { %p785_p1 = scmp.lt.u32.totalorder %s778_s11, %s1264_s4 }
  0x55   : > { %p781_p9 = pnand %p779_p7, %p1032_p8 }
  0x57   : > { %p782_p4 = pneg %p781_p9 }
  0x59   : > { %p787_p3 = pnand %p785_p1, %p782_p4 }
  0x5b   : > { %790 = shalt.err (!%p787_p3)
}
  0x5c   : > { %s791_s8 = scalar_lea.vmem %s229_s7, 16  ;;  %s798_s28 = scalar_lea.vmem %s229_s7, 32 }
  0x5d   : > { %p792_p10 = scmp.ne.s32.totalorder %s229_s7, %s791_s8  ;;  %p799_p13 = scmp.lt.s32.totalorder %s229_s7, %s229_s7 }
  0x5e   : > { %p800_p0 = scmp.lt.s32.totalorder %s798_s28, %s791_s8 }
  0x5f   : > { %p794_p11 = pnand %p792_p10, %p1032_p8 }
  0x60   : > { %p801_p2 = por %p800_p0, %p799_p13 }
  0x61   : > { %p795_p12 = pneg %p794_p11 }
  0x63   : > { %p802_p5 = pnand %p801_p2, %p795_p12 }
  0x65   : > { %805 = shalt.err (!%p802_p5)
}
  0x66   : > { %615 = dma.hbm_to_vmem [thread:$0]  (!%p1016_p6), %s1264_s4, 16, %s229_s7, [#allocation9]  }
  0x67   : > { %s546_s14 = sadd.s32 4294967294, %s926_s23   ;;  %s35_s27 = sadd.s32 1, %s922_s22 }
  0x68   : > { %p37_p8 = scmp.ge.s32.totalorder %s35_s27, 2  ;;  %s44_s6 = sadd.s32 1, %s914_s20 }
  0x69   : > { %p51_p7 = scmp.ne.s32.totalorder %s914_s20, %s910_s19  ;;  %p52_p9 = scmp.eq.s32.totalorder %s926_s23, 0 }
  0x6a   : > { %s1291_s27 = smov (%p37_p8, %s35_s27), 0  ;;  %p57_p1 = scmp.ne.s32.totalorder %s910_s19, %s906_s18 }
  0x6b   : > { %p1116_p4 = por %p52_p9, %p51_p7  ;;  %s39_s7 = ssub.s32 %s922_s22, %s1291_s27 }
  0x6c   : > { %p167_p6 = scmp.eq.s32.totalorder %s545_s24, 1  ;;  %p42_p3 = scmp.eq.s32.totalorder %s39_s7, 0 }
  0x6d   : > { %p1275_p10 = scmp.ne.s32.totalorder %s1270_s25, 0  ;;  %p173_p13 = scmp.eq.s32.totalorder %s546_s14, 1 }
  0x6e   : > { %p1132_p12 = por %p167_p6, %p51_p7  ;;  %p628_p2 = scmp.lt.s32.totalorder %s926_s23, 2 }
  0x6f   : > { %p1128_p11 = por %p1275_p10, %p57_p1  ;;  %p1139_p0 = por %p173_p13, %p57_p1 }
  0x70   : > { %s1277_s10 = scalar_select %p1132_p12, 1, 0 }
  0x71   : > { %s1137_s11 = scalar_select %p42_p3, %s914_s20, %s44_s6  }
  0x72   : > { %s1278_s12 = scalar_select %p1139_p0, 1, 0 }
  0x73   : > { %s239_s13 = sand.u32 1, %s914_s20   ;;  %s554_s24 = sshll.u32 %s922_s22, 7 }
  0x74   : > { %s553_s15 = sshll.u32 %s239_s13, 3  ;;  %s1149_s28 = scalar_lea.hbm %s1260_s0, %s554_s24 }
  0x75   : > { %s243_s30 = scalar_lea.vmem [#allocation2], %s553_s15  ;;  %p1153_p5 = pnand %p628_p2, %p1116_p4 }
  0x76   : > { %s251_s17 = sshll.u32 %s243_s30, 4  ;;  %s240_s6 = scalar_lea.sflag [#allocation3], %s239_s13  ;;  %s1157_s17 = int_to_ptr.vmem [resolvable:$true] %s251_s17 }
  0x77   : > { %s806_s7 = scalar_lea.hbm %s1149_s28, 128  ;;  %p808_p7 = pneg %p1153_p5 }
  0x78   : > { %p807_p8 = scmp.ne.s32.totalorder %s1149_s28, %s806_s7  ;;  %s811_s29 = scalar_lea.hbm %s1260_s0, 256 }
  0x79   : > { %p812_p4 = scmp.lt.u32.totalorder %s1149_s28, %s1260_s0  ;;  %p813_p6 = scmp.lt.u32.totalorder %s811_s29, %s806_s7 }
  0x7a   : > { %p809_p9 = pnand %p808_p7, %p807_p8  ;;  %p815_p10 = scmp.lt.u32.totalorder %s806_s7, %s1149_s28 }
  0x7b   : > { %p814_p3 = por %p813_p6, %p812_p4 }
  0x7c   : > { %p810_p1 = pneg %p809_p9 }
  0x7d   : > { %p816_p13 = por %p815_p10, %p814_p3 }
  0x7f   : > { %p817_p2 = pnand %p816_p13, %p810_p1 }
  0x81   : > { %820 = shalt.err (!%p817_p2)
}
  0x82   : > { %s821_s13 = scalar_lea.vmem %s1157_s17, 128  ;;  %s934_s30 = smov [#allocation2]  }
  0x83   : > { %p822_p8 = scmp.ne.s32.totalorder %s1157_s17, %s821_s13  ;;  %s826_s24 = sshll.u32 %s934_s30, 4  ;;  %s827_s24 = int_to_ptr.vmem [resolvable:$false] %s826_s24 }
  0x84   : > { %s828_s15 = scalar_lea.vmem %s827_s24, 256  ;;  %p829_p12 = scmp.lt.s32.totalorder %s1157_s17, %s827_s24 }
  0x85   : > { %p824_p9 = pnand %p822_p8, %p808_p7  ;;  %p830_p4 = scmp.lt.s32.totalorder %s828_s15, %s821_s13 }
  0x87   : > { %p825_p0 = pneg %p824_p9  ;;  %p831_p6 = por %p830_p4, %p829_p12 }
  0x89   : > { %p832_p3 = pnand %p831_p6, %p825_p0 }
  0x8b   : > { %835 = shalt.err (!%p832_p3)
}
  0x8c   : > { %619 = dma.hbm_to_vmem [thread:$0]  (!%p1153_p5), %s1149_s28, 128, %s1157_s17, %s240_s6  }
  0x8d   : > { %p1280_p1 = scmp.ne.s32.totalorder %s1271_s26, 0 }
  0x8e   : > { %s1187_s7 = sand.u32 (!%p1280_p1), 1, %s910_s19  }
  0x8f   : > { %260 = sbr.rel (%p1280_p1) target bundleno = 702 (0x2be), region = 40  ;;  %s556_s29 = sshll.u32 (!%p1280_p1), %s1187_s7, 3 }
  0x90   : > { %s263_s16 = scalar_lea.sflag (!%p1280_p1), [#allocation3], %s1187_s7  ;;  %s266_s8 = scalar_lea.vmem (!%p1280_p1), [#allocation2], %s556_s29 }
  0x96   : > { %889 = dma.done.wait (%p1128_p11), %s263_s16, 128  }
  0x97   : > { %891 = vsyncadd (%p1128_p11), %s263_s16, 4294967168  ;;  %p1281_p12 = scmp.ne.s32.totalorder %s1270_s25, 0 }
  0x99   : > { %893 = dma.done.wait (%p1281_p12), [#allocation6], 32  }
  0x9a   : > { %895 = vsyncadd (%p1281_p12), [#allocation6], 4294967264 }
  0x9b   : > { %897 = dma.done.wait (%p1281_p12), [#allocation9], 272  }
  0x9c   : > { %899 = vsyncadd (%p1281_p12), [#allocation9], 4294967024  ;;  %vm313_vm0 = vcmask 261120   ;;  %v310_v0 = vld [vmem:[%s266_s8] sm:$0xff]  ;;  %v690_v7 = vld [vmem:[#allocation8] sm:$0xff]   ;;  %v935_v8 = vmov 0.0  }
  0x9d   : > { %v314_v1 = vsel %vm313_vm0, %v310_v0, 0.0  ;;  %575 = vmatprep.subr.bf16.mxu0 %v935_v8  ;;  %v691_v9 = vld [vmem:[#allocation8 + $0x8] sm:$0xff]   ;;  %vm936_vm1 = vmmov 0   ;;  %v562_v14 = vld [vmem:[#allocation5] ss:$0 sm:$0xff]  ;;  %s561_s25 = sshll.u32 %s1187_s7, 2 }
  0x9e   : > { %315 = vadd.xlane.f32.xlu0 %v314_v1  ;;  %576 = vmatpush3.bf16.msra.mxu0 %v690_v7  ;;  %v563_v16 = vld [vmem:[#allocation7] ss:$0 sm:$0xff]  ;;  %v564_v20 = vld [vmem:[#allocation10] ss:$0 sm:$0xff]  ;;  %s569_s26 = sshll.u32 %s918_s21, 6  ;;  %s308_s9 = scalar_lea.vmem [#allocation11], %s561_s25 }
  0x9f   : > { %579 = vmatprep.mubr.msk.bf16.mxu0 %vm936_vm1, %v935_v8  ;;  %577 = vmatprep.subr.bf16.mxu0 %v935_v8  ;;  %s427_s28 = sshll.u32 %s308_s9, 4  ;;  %vm410_vm2 = vcmask 781312   ;;  %s1211_s6 = scalar_lea.hbm %s1265_s5, %s569_s26  ;;  %s1213_s28 = int_to_ptr.vmem [resolvable:$true] %s427_s28 }
  0xa0   : > { %s413_s21 = scalar_lea.sflag [#allocation4], %s1187_s7  ;;  %s836_s13 = scalar_lea.vmem %s1213_s28, 64 }
  0xa1   : > { %p837_p11 = scmp.ne.s32.totalorder %s1213_s28, %s836_s13  ;;  %p1282_p0 = scmp.ne.s32.totalorder %s1277_s10, 0 }
  0xa2   : > { %578 = vmatpush3.bf16.msra.mxu0 %v691_v9  ;;  %s937_s30 = smov [#allocation11]  }
  0xa3   : > { %p838_p5 = pnand %p837_p11, %p1282_p0  ;;  %s840_s24 = sshll.u32 %s937_s30, 4  ;;  %s841_s24 = int_to_ptr.vmem [resolvable:$false] %s840_s24 }
  0xa4   : > { %s842_s15 = scalar_lea.vmem %s841_s24, 128  ;;  %p843_p10 = scmp.lt.s32.totalorder %s1213_s28, %s841_s24 }
  0xa5   : > { %p839_p7 = pneg %p838_p5  ;;  %p844_p13 = scmp.lt.s32.totalorder %s842_s15, %s836_s13 }
  0xa7   : > { %p845_p2 = por %p844_p13, %p843_p10 }
  0xa9   : > { %p846_p8 = pnand %p845_p2, %p839_p7 }
 0x12b   : > { %v316_v2 = vpop.xlane.xlu0 %315 }
 0x12c   : > { %v318_v3 = vmul.f32 0.03125, %v316_v2 }
 0x12e   : > { %v319_v4 = vsub.f32 %v310_v0, %v318_v3 }
 0x130   : > { %v320_v5 = vmul.f32 %v319_v4, %v319_v4 }
 0x132   : > { %v321_v6 = vsel %vm313_vm0, %v320_v5, 0.0 }
 0x133   : > { %322 = vadd.xlane.f32.xlu0 %v321_v6 }
 0x1c0   : > { %v323_v10 = vpop.xlane.xlu0 %322 }
 0x1c1   : > { %v324_v11 = vmul.f32 0.03125, %v323_v10 }
 0x1c3   : > { %v325_v12 = vadd.f32 1e-05, %v324_v11 }
 0x1c5   : > { %692 = vrsqrt.f32 %v325_v12 }
 0x1cf   : > { %v693_v13 = vpop.eup %692 }
 0x1d0   : > { %v327_v15 = vmul.f32 %v693_v13, %v319_v4 }
 0x1d2   : > { %v334_v17 = vmul.f32 %v562_v14, %v327_v15 }
 0x1d4   : > { %v341_v18 = vadd.f32 %v563_v16, %v334_v17 }
 0x1d6   : > { %v342_v19 = vpack.c.bf16 %v341_v18, %v341_v18 }
 0x1d8   : > { %580 = vmatmul.mubr.msk.bf16.vlgmr.msra.gmra.mrb[0].mxu0 %vm313_vm0, %v342_v19 }
 0x2ab   : > { %v403_v21 = vpop.f32.mrb[0].mxu0 }
 0x2ac   : > { %v404_v22 = vadd.f32 %v564_v20, %v403_v21  ;;  %v581_v23 = vpop.f32.mrb[1].mxu0 }
 0x2ad   : > { %v406_v24 = vpop.f32.mrb[2].mxu0 }
 0x2ae   : > { %v409_v25 = vpack.c.bf16 %v404_v22, %v404_v22  ;;  %v582_v26 = vpop.f32.mrb[3].mxu0 }
 0x2b0   : > { %411 = vst.msk [vmem:[%s308_s9] sm:$0xf] %vm410_vm2, %v409_v25 }
 0x2b1   : > { %849 = shalt.err (!%p846_p8)
}
 0x2b2   : > { %s850_s7 = scalar_lea.hbm %s1211_s6, 64  ;;  %s854_s8 = scalar_lea.hbm %s1265_s5, 128 }
 0x2b3   : > { %p851_p9 = scmp.ne.s32.totalorder %s1211_s6, %s850_s7  ;;  %p855_p3 = scmp.lt.u32.totalorder %s1211_s6, %s1265_s5 }
 0x2b4   : > { %p856_p1 = scmp.lt.u32.totalorder %s854_s8, %s850_s7  ;;  %p858_p11 = scmp.lt.u32.totalorder %s850_s7, %s1211_s6 }
 0x2b5   : > { %p852_p4 = pnand %p851_p9, %p1282_p0 }
 0x2b6   : > { %p857_p12 = por %p856_p1, %p855_p3 }
 0x2b7   : > { %p853_p6 = pneg %p852_p4 }
 0x2b8   : > { %p859_p5 = por %p858_p11, %p857_p12 }
 0x2ba   : > { %p860_p7 = pnand %p859_p5, %p853_p6 }
 0x2bc   : > { %863 = shalt.err (!%p860_p7)
}
 0x2bd   : > { %601 = dma.vmem_to_hbm [thread:$0]  (%p1282_p0), %s1213_s28, 64, %s1211_s6, %s413_s21  }
 0x2be PF: > { %s439_s9 = sand.u32 1, %s906_s18   ;;  %p1283_p10 = scmp.ne.s32.totalorder %s1278_s12, 0 }
 0x2bf   : > { %p1284_p13 = scmp.ge.s32.totalorder %s926_s23, 2  ;;  %s440_s17 = scalar_lea.sflag [#allocation4], %s439_s9 }
 0x2c1   : > { %p621_p2 = pnand %p1284_p13, %p1283_p10 }
 0x2c3   : > { %901 = dma.done.wait (!%p621_p2), %s440_s17, 64  }
 0x2c4   : > { %903 = vsyncadd (!%p621_p2), %s440_s17, 4294967232  ;;  %s23_s23 = sadd.s32 1, %s926_s23   ;;  %s1285_s18 = smov %s910_s19 }
 0x2c5   : > { %p20_p8 = scmp.ge.s32.totalorder %s23_s23, 4   ;;  %s1286_s19 = smov %s914_s20 }
 0x2c6   : > { %s1287_s20 = smov %s1137_s11  ;;  %s1288_s21 = smov %s922_s22 }
 0x2c7   : > { %s1289_s22 = smov %s1291_s27  ;;  %22 = sbr.rel (!%p20_p8) target bundleno = 8 (0x8), region = 101 }
 0x2ce   :  { %445 = vsyncpa [#allocation3], 1 }
 0x2cf   :  { %447 = vsyncpa [#allocation3 + $0x1], 1 }
 0x2d0   :  { %448 = vsyncpa [#allocation6], 1 }
 0x2d1   :  { %449 = vsyncpa [#allocation9], 1 }
 0x2d2   :  { %450 = vsyncpa [#allocation4], 1 }
 0x2d3   :  { %452 = vsyncpa [#allocation4 + $0x1], 1 }

</bundles_post_ra>
